<compile_context>
chip_gen: v5e
topology: v5e:2x2
jax: 0.10.0
libtpu: 0.0.40
codegen_flags: <defaults>
</compile_context>

<pallas_src>
import functools

import jax
import jax.numpy as jnp
from jax.experimental import pallas as pl
from jax.experimental.pallas import tpu as pltpu

K_IN = 784      # real input features (28*28); not padded — equals full last dim of x
H1 = 32
H2 = 16
C_OUT = 10      # real classes
C_PAD = 128     # lane-dense output width (unmasked vst)


def _round_up(n, m):
    return ((n + m - 1) // m) * m


def mlp_kernel(x_ref, w1_ref, b1_ref, w2_ref, b2_ref, w3_ref, b3_ref, out_ref):
    # One batch tile per grid step: (TB, 784) f32 in, (TB, 128) f32 out.
    x = x_ref[...].astype(jnp.bfloat16)          # cast in-VMEM; x streamed from HBM as raw f32
    b1 = b1_ref[...]                             # (1, 32)  f32
    b2 = b2_ref[...]                             # (1, 16)  f32
    b3 = b3_ref[...]                             # (1, 128) f32 (-1e30 in padded class slots)

    h1 = jnp.dot(x, w1_ref[...], preferred_element_type=jnp.float32) + b1
    h1 = jnp.tanh(h1).astype(jnp.bfloat16)                              # (TB, 32)

    h2 = jnp.dot(h1, w2_ref[...], preferred_element_type=jnp.float32) + b2
    h2 = jnp.tanh(h2).astype(jnp.bfloat16)                              # (TB, 16)

    logits = jnp.dot(h2, w3_ref[...], preferred_element_type=jnp.float32) + b3
    # (TB, 128); padded classes sit at ~-1e30 so exp() of them is exactly 0.

    m = jnp.max(logits, axis=1, keepdims=True)
    shifted = logits - m
    lse = jnp.log(jnp.sum(jnp.exp(shifted), axis=1, keepdims=True))
    out_ref[...] = shifted - lse


def prepare_params(params):
    """Cast/pad PyTorch-equivalent f32 (in,out) weights into kernel-ready form (done once)."""
    w1, b1, w2, b2, w3, b3 = params

    w1p = w1.astype(jnp.bfloat16)                                       # (784, 32)
    w2p = w2.astype(jnp.bfloat16)                                       # (32, 16)
    w3p = jnp.zeros((H2, C_PAD), jnp.bfloat16).at[:, :C_OUT].set(w3.astype(jnp.bfloat16))

    b1p = b1.reshape(1, H1).astype(jnp.float32)
    b2p = b2.reshape(1, H2).astype(jnp.float32)
    # Padded classes get a huge negative bias so exp() of them is exactly 0 under log_softmax.
    b3p = jnp.full((1, C_PAD), -1e30, jnp.float32).at[0, :C_OUT].set(b3.astype(jnp.float32))
    return (w1p, b1p, w2p, b2p, w3p, b3p)


def _choose_tb(batch, tb_cap):
    """Batch tile: <= tb_cap rows (v7x VMEM budget), >= 2 grid steps when batch allows
    (v7x megacore), rebalanced so padding on the ragged last block is < 8 rows."""
    n_tiles = max(pl.cdiv(batch, tb_cap), 1)
    if batch >= 16 and n_tiles < 2:
        n_tiles = 2
    return _round_up(pl.cdiv(batch, n_tiles), 8)


@functools.partial(jax.jit, static_argnames=("tb_cap",))
def mlp_forward(x_nchw, kernel_params, *, tb_cap=2048):
    w1p, b1p, w2p, b2p, w3p, b3p = kernel_params
    B = x_nchw.shape[0]

    # Flatten (B,1,28,28) -> (B,784). No pad, no cast: raw f32 streamed straight into the kernel.
    x = x_nchw.reshape(B, K_IN)

    tb = _choose_tb(B, tb_cap)
    grid = (pl.cdiv(B, tb),)   # ragged last block: OOB reads only feed discarded OOB rows

    cost = pl.CostEstimate(
        flops=2 * B * (K_IN * H1 + H1 * H2 + H2 * C_PAD),
        transcendentals=B * (H1 + H2 + C_PAD),
        bytes_accessed=B * (K_IN * 4 + C_PAD * 4),
    )

    out = pl.pallas_call(
        mlp_kernel,
        out_shape=jax.ShapeDtypeStruct((B, C_PAD), jnp.float32),
        grid_spec=pltpu.PrefetchScalarGridSpec(
            num_scalar_prefetch=0,
            grid=grid,
            in_specs=[
                pl.BlockSpec((tb, K_IN), lambda i: (i, 0)),    # x: streamed per batch tile (f32)
                pl.BlockSpec((K_IN, H1), lambda i: (0, 0)),    # w1: resident
                pl.BlockSpec((1, H1), lambda i: (0, 0)),       # b1
                pl.BlockSpec((H1, H2), lambda i: (0, 0)),      # w2
                pl.BlockSpec((1, H2), lambda i: (0, 0)),       # b2
                pl.BlockSpec((H2, C_PAD), lambda i: (0, 0)),   # w3
                pl.BlockSpec((1, C_PAD), lambda i: (0, 0)),    # b3
            ],
            out_specs=pl.BlockSpec((tb, C_PAD), lambda i: (i, 0)),
        ),
        compiler_params=pltpu.CompilerParams(
            dimension_semantics=("parallel",),
            vmem_limit_bytes=32 * 1024 * 1024,
        ),
        cost_estimate=cost,
    )(x, w1p, b1p, w2p, b2p, w3p, b3p)

    return out[:, :C_OUT]


def init_params(key):
    # Deterministic synthetic init (uniform like PyTorch's default Linear init),
    # stored as (in, out) == PyTorch weight (out, in) transposed.
    k = jax.random.split(key, 6)

    def linear_init(kw, kb, fan_in, fan_out):
        bound = 1.0 / jnp.sqrt(fan_in)
        w = jax.random.uniform(kw, (fan_in, fan_out), jnp.float32, -bound, bound)
        b = jax.random.uniform(kb, (fan_out,), jnp.float32, -bound, bound)
        return w, b

    w1, b1 = linear_init(k[0], k[1], K_IN, H1)
    w2, b2 = linear_init(k[2], k[3], H1, H2)
    w3, b3 = linear_init(k[4], k[5], H2, C_OUT)
    return (w1, b1, w2, b2, w3, b3)


def reference_forward(x_nchw, params):
    w1, b1, w2, b2, w3, b3 = params
    x = x_nchw.reshape(x_nchw.shape[0], -1).astype(jnp.float32)
    h1 = jnp.tanh(x @ w1 + b1)
    h2 = jnp.tanh(h1 @ w2 + b2)
    logits = h2 @ w3 + b3
    return jax.nn.log_softmax(logits, axis=1)


if __name__ == "__main__":
    key = jax.random.PRNGKey(0)
    k_x, k_p = jax.random.split(key)

    # Small MNIST-like batch, PyTorch NCHW layout (B, 1, 28, 28).
    x = jax.random.normal(k_x, (8, 1, 28, 28), dtype=jnp.float32)
    params = init_params(k_p)
    kparams = prepare_params(params)

    out = mlp_forward(x, kparams)
    out = jax.block_until_ready(out)

    ref = reference_forward(x, params)
    assert out.shape == (8, 10)
    # bf16 first matmul (f32 accumulation) vs f32 reference -> loose-ish absolute tolerance.
    assert jnp.allclose(out, ref, atol=3e-2, rtol=0.0), float(jnp.max(jnp.abs(out - ref)))

    print("KERNEL_OK")
</pallas_src>

<mosaic_0001>
module attributes {stable_mosaic.version = 11 : i64} {
  func.func @mlp_kernel(%arg0: i32, %arg1: memref<8x784xf32, #tpu.memory_space<vmem>>, %arg2: memref<784x32xbf16, #tpu.memory_space<vmem>>, %arg3: memref<1x32xf32, #tpu.memory_space<vmem>>, %arg4: memref<32x16xbf16, #tpu.memory_space<vmem>>, %arg5: memref<1x16xf32, #tpu.memory_space<vmem>>, %arg6: memref<16x128xbf16, #tpu.memory_space<vmem>>, %arg7: memref<1x128xf32, #tpu.memory_space<vmem>>, %arg8: memref<8x128xf32, #tpu.memory_space<vmem>>) attributes {dimension_semantics = [#tpu.dimension_semantics<parallel>], iteration_bounds = array<i64: 1>, scalar_prefetch = 0 : i64, scratch_operands = 0 : i64, tpu.core_type = #tpu.core_type<tc>, window_params = [{transform_indices = @transform_0, window_bounds = array<i64: 8, 784>}, {pipeline_mode = #tpu.pipeline_mode<synchronous>, transform_indices = @transform_1, window_bounds = array<i64: 784, 32>}, {pipeline_mode = #tpu.pipeline_mode<synchronous>, transform_indices = @transform_2, window_bounds = array<i64: 1, 32>}, {pipeline_mode = #tpu.pipeline_mode<synchronous>, transform_indices = @transform_3, window_bounds = array<i64: 32, 16>}, {pipeline_mode = #tpu.pipeline_mode<synchronous>, transform_indices = @transform_4, window_bounds = array<i64: 1, 16>}, {pipeline_mode = #tpu.pipeline_mode<synchronous>, transform_indices = @transform_5, window_bounds = array<i64: 16, 128>}, {pipeline_mode = #tpu.pipeline_mode<synchronous>, transform_indices = @transform_6, window_bounds = array<i64: 1, 128>}, {transform_indices = @transform_7, window_bounds = array<i64: 8, 128>}]} {
    %c0 = arith.constant 0 : index
    %c0_0 = arith.constant 0 : index
    %0 = vector.load %arg1[%c0, %c0_0] : memref<8x784xf32, #tpu.memory_space<vmem>>, vector<8x784xf32>
    %1 = arith.truncf %0 : vector<8x784xf32> to vector<8x784xbf16>
    %c0_1 = arith.constant 0 : index
    %c0_2 = arith.constant 0 : index
    %2 = vector.load %arg3[%c0_1, %c0_2] : memref<1x32xf32, #tpu.memory_space<vmem>>, vector<1x32xf32>
    %c0_3 = arith.constant 0 : index
    %c0_4 = arith.constant 0 : index
    %3 = vector.load %arg5[%c0_3, %c0_4] : memref<1x16xf32, #tpu.memory_space<vmem>>, vector<1x16xf32>
    %c0_5 = arith.constant 0 : index
    %c0_6 = arith.constant 0 : index
    %4 = vector.load %arg7[%c0_5, %c0_6] : memref<1x128xf32, #tpu.memory_space<vmem>>, vector<1x128xf32>
    %c0_7 = arith.constant 0 : index
    %c0_8 = arith.constant 0 : index
    %5 = vector.load %arg2[%c0_7, %c0_8] : memref<784x32xbf16, #tpu.memory_space<vmem>>, vector<784x32xbf16>
    %cst = arith.constant dense<0.000000e+00> : vector<8x32xf32>
    %6 = tpu.matmul %1, %5, %cst {dimension_numbers = #tpu.dot_dimension_numbers<[1], [0], [0], [1], [0, 0, 1, 1], [], []>} : vector<8x784xbf16>, vector<784x32xbf16>, vector<8x32xf32> -> vector<8x32xf32>
    %7 = vector.broadcast %2 : vector<1x32xf32> to vector<8x32xf32>
    %8 = arith.addf %6, %7 : vector<8x32xf32>
    %9 = math.tanh %8 : vector<8x32xf32>
    %10 = arith.truncf %9 : vector<8x32xf32> to vector<8x32xbf16>
    %c0_9 = arith.constant 0 : index
    %c0_10 = arith.constant 0 : index
    %11 = vector.load %arg4[%c0_9, %c0_10] : memref<32x16xbf16, #tpu.memory_space<vmem>>, vector<32x16xbf16>
    %cst_11 = arith.constant dense<0.000000e+00> : vector<8x16xf32>
    %12 = tpu.matmul %10, %11, %cst_11 {dimension_numbers = #tpu.dot_dimension_numbers<[1], [0], [0], [1], [0, 0, 1, 1], [], []>} : vector<8x32xbf16>, vector<32x16xbf16>, vector<8x16xf32> -> vector<8x16xf32>
    %13 = vector.broadcast %3 : vector<1x16xf32> to vector<8x16xf32>
    %14 = arith.addf %12, %13 : vector<8x16xf32>
    %15 = math.tanh %14 : vector<8x16xf32>
    %16 = arith.truncf %15 : vector<8x16xf32> to vector<8x16xbf16>
    %c0_12 = arith.constant 0 : index
    %c0_13 = arith.constant 0 : index
    %17 = vector.load %arg6[%c0_12, %c0_13] : memref<16x128xbf16, #tpu.memory_space<vmem>>, vector<16x128xbf16>
    %cst_14 = arith.constant dense<0.000000e+00> : vector<8x128xf32>
    %18 = tpu.matmul %16, %17, %cst_14 {dimension_numbers = #tpu.dot_dimension_numbers<[1], [0], [0], [1], [0, 0, 1, 1], [], []>} : vector<8x16xbf16>, vector<16x128xbf16>, vector<8x128xf32> -> vector<8x128xf32>
    %19 = vector.broadcast %4 : vector<1x128xf32> to vector<8x128xf32>
    %20 = arith.addf %18, %19 : vector<8x128xf32>
    %cst_15 = arith.constant dense<0xFF800000> : vector<8xf32>
    %21 = vector.multi_reduction <maximumf>, %20, %cst_15 [1] : vector<8x128xf32> to vector<8xf32>
    %22 = vector.shape_cast %21 : vector<8xf32> to vector<8x1xf32>
    %23 = vector.broadcast %22 : vector<8x1xf32> to vector<8x128xf32>
    %24 = arith.subf %20, %23 : vector<8x128xf32>
    %25 = math.exp %24 : vector<8x128xf32>
    %cst_16 = arith.constant dense<0.000000e+00> : vector<8xf32>
    %26 = vector.multi_reduction <add>, %25, %cst_16 [1] : vector<8x128xf32> to vector<8xf32>
    %27 = vector.shape_cast %26 : vector<8xf32> to vector<8x1xf32>
    %28 = math.log %27 : vector<8x1xf32>
    %29 = vector.broadcast %28 : vector<8x1xf32> to vector<8x128xf32>
    %30 = arith.subf %24, %29 : vector<8x128xf32>
    %c0_17 = arith.constant 0 : index
    %c0_18 = arith.constant 0 : index
    %31 = vector.load %arg8[%c0_17, %c0_18] : memref<8x128xf32, #tpu.memory_space<vmem>>, vector<8x128xf32>
    tpu.vector_store %arg8[%c0_17, %c0_18], %30 {strides = array<i32>} : memref<8x128xf32, #tpu.memory_space<vmem>>, vector<8x128xf32>,
    return
  }
  func.func @transform_0(%arg0: i32) -> (i32, i32) {
    %c0_i32 = arith.constant 0 : i32
    %c0_i32_0 = arith.constant 0 : i32
    return %arg0, %c0_i32 : i32, i32
  }
  func.func @transform_1(%arg0: i32) -> (i32, i32) {
    %c0_i32 = arith.constant 0 : i32
    %c0_i32_0 = arith.constant 0 : i32
    %c0_i32_1 = arith.constant 0 : i32
    return %c0_i32, %c0_i32_0 : i32, i32
  }
  func.func @transform_2(%arg0: i32) -> (i32, i32) {
    %c0_i32 = arith.constant 0 : i32
    %c0_i32_0 = arith.constant 0 : i32
    %c0_i32_1 = arith.constant 0 : i32
    return %c0_i32, %c0_i32_0 : i32, i32
  }
  func.func @transform_3(%arg0: i32) -> (i32, i32) {
    %c0_i32 = arith.constant 0 : i32
    %c0_i32_0 = arith.constant 0 : i32
    %c0_i32_1 = arith.constant 0 : i32
    return %c0_i32, %c0_i32_0 : i32, i32
  }
  func.func @transform_4(%arg0: i32) -> (i32, i32) {
    %c0_i32 = arith.constant 0 : i32
    %c0_i32_0 = arith.constant 0 : i32
    %c0_i32_1 = arith.constant 0 : i32
    return %c0_i32, %c0_i32_0 : i32, i32
  }
  func.func @transform_5(%arg0: i32) -> (i32, i32) {
    %c0_i32 = arith.constant 0 : i32
    %c0_i32_0 = arith.constant 0 : i32
    %c0_i32_1 = arith.constant 0 : i32
    return %c0_i32, %c0_i32_0 : i32, i32
  }
  func.func @transform_6(%arg0: i32) -> (i32, i32) {
    %c0_i32 = arith.constant 0 : i32
    %c0_i32_0 = arith.constant 0 : i32
    %c0_i32_1 = arith.constant 0 : i32
    return %c0_i32, %c0_i32_0 : i32, i32
  }
  func.func @transform_7(%arg0: i32) -> (i32, i32) {
    %c0_i32 = arith.constant 0 : i32
    %c0_i32_0 = arith.constant 0 : i32
    return %arg0, %c0_i32 : i32, i32
  }
}

</mosaic_0001>

<bundles_post_ra>
// kernel: mlp_forward.1
= control target key start
LH: loop header
LB: loop body
LE: loop exit
PB: predicated region body
PF: predicated region fallthrough
CT: control target
= control target key end

     0   :  { %s1162_s0 = inlined_call_operand.vmem [shape: f32[8,784], index: 0, kind: input, shape index: {}]   ;;  %s1163_s1 = inlined_call_operand.vmem [shape: bf16[784,32], index: 1, kind: input, shape index: {}]   ;;  %s1164_s2 = inlined_call_operand.vmem [shape: f32[1,32], index: 2, kind: input, shape index: {}]   ;;  %s1165_s3 = inlined_call_operand.vmem [shape: bf16[32,16], index: 3, kind: input, shape index: {}]   ;;  %s1166_s4 = inlined_call_operand.vmem [shape: f32[1,16], index: 4, kind: input, shape index: {}]   ;;  %s1167_s5 = inlined_call_operand.vmem [shape: bf16[16,128], index: 5, kind: input, shape index: {}]   ;;  %s1168_s6 = inlined_call_operand.vmem [shape: f32[1,128], index: 6, kind: input, shape index: {}]   ;;  %s1169_s7 = inlined_call_operand.hbm [shape: f32[8,128], index: 7, kind: output, shape index: {}]  }
   0x1   :  { %v847_v0 = vld [vmem:[%s1163_s1 + $0x38] sm:$0xff]  ;;  %v846_v3 = vld [vmem:[%s1163_s1 + $0x30] sm:$0xff]  ;;  %v845_v8 = vld [vmem:[%s1163_s1 + $0x28] sm:$0xff] }
   0x2   :  { %v855_v1 = vld [vmem:[%s1163_s1 + $0x78] sm:$0xff]  ;;  %444 = vmatpush.bf16.msra.mxu0 %v847_v0  ;;  %v854_v4 = vld [vmem:[%s1163_s1 + $0x70] sm:$0xff]  ;;  %v853_v9 = vld [vmem:[%s1163_s1 + $0x68] sm:$0xff] }
   0x3   :  { %v863_v2 = vld [vmem:[%s1163_s1 + $0xb8] sm:$0xff]  ;;  %457 = vmatpush.bf16.msra.mxu1 %v855_v1  ;;  %v862_v5 = vld [vmem:[%s1163_s1 + $0xb0] sm:$0xff]  ;;  %v861_v10 = vld [vmem:[%s1163_s1 + $0xa8] sm:$0xff] }
   0x4   :  { %470 = vmatpush.bf16.msra.mxu2 %v863_v2  ;;  %v871_v6 = vld [vmem:[%s1163_s1 + $0xf8] sm:$0xff]  ;;  %v870_v7 = vld [vmem:[%s1163_s1 + $0xf0] sm:$0xff]  ;;  %v869_v11 = vld [vmem:[%s1163_s1 + $0xe8] sm:$0xff] }
   0x5   :  { %483 = vmatpush.bf16.msra.mxu3 %v871_v6  ;;  %v844_v12 = vld [vmem:[%s1163_s1 + $0x20] sm:$0xff]  ;;  %v843_v16 = vld [vmem:[%s1163_s1 + $0x18] sm:$0xff] }
   0x6   :  { %445 = vmatpush.bf16.msra.mxu0 %v846_v3  ;;  %v852_v13 = vld [vmem:[%s1163_s1 + $0x60] sm:$0xff]  ;;  %v851_v17 = vld [vmem:[%s1163_s1 + $0x58] sm:$0xff] }
   0x7   :  { %458 = vmatpush.bf16.msra.mxu1 %v854_v4  ;;  %v860_v14 = vld [vmem:[%s1163_s1 + $0xa0] sm:$0xff]  ;;  %v859_v18 = vld [vmem:[%s1163_s1 + $0x98] sm:$0xff] }
   0x8   :  { %471 = vmatpush.bf16.msra.mxu2 %v862_v5  ;;  %v868_v15 = vld [vmem:[%s1163_s1 + $0xe0] sm:$0xff]  ;;  %v867_v19 = vld [vmem:[%s1163_s1 + $0xd8] sm:$0xff] }
   0x9   :  { %484 = vmatpush.bf16.msra.mxu3 %v870_v7 }
   0xa   :  { %446 = vmatpush.bf16.msra.mxu0 %v845_v8 }
   0xb   :  { %459 = vmatpush.bf16.msra.mxu1 %v853_v9 }
   0xc   :  { %472 = vmatpush.bf16.msra.mxu2 %v861_v10 }
   0xd   :  { %485 = vmatpush.bf16.msra.mxu3 %v869_v11 }
   0xe   :  { %447 = vmatpush.bf16.msra.mxu0 %v844_v12 }
   0xf   :  { %460 = vmatpush.bf16.msra.mxu1 %v852_v13 }
  0x10   :  { %473 = vmatpush.bf16.msra.mxu2 %v860_v14 }
  0x11   :  { %486 = vmatpush.bf16.msra.mxu3 %v868_v15 }
  0x12   :  { %12 = vsyncpa [#allocation3], 0  ;;  %448 = vmatpush.bf16.msra.mxu0 %v843_v16  ;;  %v842_v20 = vld [vmem:[%s1163_s1 + $0x10] sm:$0xff]  ;;  %v841_v24 = vld [vmem:[%s1163_s1 + $0x8] sm:$0xff]  ;;  %vm440_vm0 = vcmask 130048   ;;  %vm556_vm1 = vcmask 261120  }
  0x13   :  { %461 = vmatpush.bf16.msra.mxu1 %v851_v17  ;;  %v850_v21 = vld [vmem:[%s1163_s1 + $0x50] sm:$0xff]  ;;  %v849_v25 = vld [vmem:[%s1163_s1 + $0x48] sm:$0xff]  ;;  %v840_v27 = vld [vmem:[%s1163_s1] sm:$0xff]  ;;  %s620_s8 = sshll.u32 %s1169_s7, 4  ;;  %s621_s8 = int_to_ptr.hbm [resolvable:$true] %s620_s8 }
  0x14   :  { %474 = vmatpush.bf16.msra.mxu2 %v859_v18  ;;  %v858_v22 = vld [vmem:[%s1163_s1 + $0x90] sm:$0xff]  ;;  %v857_v26 = vld [vmem:[%s1163_s1 + $0x88] sm:$0xff]  ;;  %v848_v29 = vld [vmem:[%s1163_s1 + $0x40] sm:$0xff] }
  0x15   :  { %487 = vmatpush.bf16.msra.mxu3 %v867_v19  ;;  %v866_v23 = vld [vmem:[%s1163_s1 + $0xd0] sm:$0xff]  ;;  %v865_v28 = vld [vmem:[%s1163_s1 + $0xc8] sm:$0xff]  ;;  %v28_v30 = vld [vmem:[%s1162_s0] sm:$0xff] }
  0x16   :  { %449 = vmatpush.bf16.msra.mxu0 %v842_v20  ;;  %v29_v31 = vld [vmem:[%s1162_s0 + $0x8] sm:$0xff]  ;;  %v879_v32 = vld [vmem:[%s1163_s1 + $0x138] sm:$0xff]  ;;  %v856_v34 = vld [vmem:[%s1163_s1 + $0x80] sm:$0xff]  ;;  %v35_v36 = vpack.c.bf16 %v28_v30, %v28_v30 }
  0x17   :  { %462 = vmatpush.bf16.msra.mxu1 %v850_v21  ;;  %v887_v33 = vld [vmem:[%s1163_s1 + $0x178] sm:$0xff]  ;;  %v30_v35 = vld [vmem:[%s1162_s0 + $0x10] sm:$0xff]  ;;  %v36_v37 = vpack.c.bf16 %v29_v31, %v29_v31  ;;  %v864_v38 = vld [vmem:[%s1163_s1 + $0xc0] sm:$0xff] }
  0x18   :  { %475 = vmatpush.bf16.msra.mxu2 %v858_v22  ;;  %v888_v39 = vld [vmem:[%s1163_s1 + $0x180] sm:$0xff]  ;;  %v31_v40 = vld [vmem:[%s1162_s0 + $0x18] sm:$0xff]  ;;  %v878_v41 = vld [vmem:[%s1163_s1 + $0x130] sm:$0xff]  ;;  %v37_v43 = vpack.c.bf16 %v30_v35, %v30_v35 }
  0x19   :  { %488 = vmatpush.bf16.msra.mxu3 %v866_v23  ;;  %v886_v42 = vld [vmem:[%s1163_s1 + $0x170] sm:$0xff]  ;;  %v38_v44 = vpack.c.bf16 %v31_v40, %v31_v40  ;;  %v877_v45 = vld [vmem:[%s1163_s1 + $0x128] sm:$0xff]  ;;  %v876_v47 = vld [vmem:[%s1163_s1 + $0x120] sm:$0xff] }
  0x1a   :  { %450 = vmatpush.bf16.msra.mxu0 %v841_v24  ;;  %v885_v46 = vld [vmem:[%s1163_s1 + $0x168] sm:$0xff]  ;;  %v884_v48 = vld [vmem:[%s1163_s1 + $0x160] sm:$0xff]  ;;  %v875_v49 = vld [vmem:[%s1163_s1 + $0x118] sm:$0xff] }
  0x1b   :  { %463 = vmatpush.bf16.msra.mxu1 %v849_v25  ;;  %v883_v50 = vld [vmem:[%s1163_s1 + $0x158] sm:$0xff]  ;;  %v34_v51 = vld [vmem:[%s1162_s0 + $0x30] sm:$0xff]  ;;  %v873_v55 = vld [vmem:[%s1163_s1 + $0x108] sm:$0xff] }
  0x1c   :  { %476 = vmatpush.bf16.msra.mxu2 %v857_v26  ;;  %v874_v52 = vld [vmem:[%s1163_s1 + $0x110] sm:$0xff]  ;;  %v41_v54 = vpack.c.bf16 %v34_v51, %v34_v51  ;;  %v881_v56 = vld [vmem:[%s1163_s1 + $0x148] sm:$0xff]  ;;  %v872_v57 = vld [vmem:[%s1163_s1 + $0x100] sm:$0xff] }
  0x1d   :  { %489 = vmatpush.bf16.msra.mxu3 %v865_v28  ;;  %v882_v53 = vld [vmem:[%s1163_s1 + $0x150] sm:$0xff]  ;;  %v880_v58 = vld [vmem:[%s1163_s1 + $0x140] sm:$0xff]  ;;  %v33_v60 = vld [vmem:[%s1162_s0 + $0x28] sm:$0xff] }
  0x1e   :  { %451 = vmatpush.bf16.msra.mxu0 %v840_v27  ;;  %v32_v59 = vld [vmem:[%s1162_s0 + $0x20] sm:$0xff]  ;;  %v40_v62 = vpack.c.bf16 %v33_v60, %v33_v60  ;;  %v890_v1 = vld [vmem:[%s1165_s3 + $0x8] sm:$0xff] }
  0x1f   :  { %464 = vmatpush.bf16.msra.mxu1 %v848_v29  ;;  %v39_v61 = vpack.c.bf16 %v32_v59, %v32_v59  ;;  %v889_v4 = vld [vmem:[%s1165_s3] sm:$0xff] }
  0x20   :  { %477 = vmatpush.bf16.msra.mxu2 %v856_v34  ;;  %v893_v7 = vld [vmem:[%s1164_s2] ss:$0 sm:$0xff] }
  0x21   :  { %452 = vmatmul.bf16.vlgmr.msra.gmra.mxu0 %v35_v36  ;;  %490 = vmatpush.bf16.msra.mxu3 %v864_v38  ;;  %v891_v8 = vld [vmem:[%s1167_s5] sm:$0xff] }
  0x22   :  { %496 = vmatpush.bf16.msrb.mxu0 %v879_v32  ;;  %465 = vmatmul.bf16.vlgmr.msra.gmra.mxu1 %v36_v37  ;;  %v894_v26 = vld [vmem:[%s1166_s4] ss:$0 sm:$0xff]  ;;  %s930_s4 = smov [#allocation2]  }
  0x23   :  { %509 = vmatpush.bf16.msrb.mxu1 %v887_v33  ;;  %478 = vmatmul.bf16.vlgmr.msra.gmra.mxu2 %v37_v43  ;;  %v895_v32 = vld [vmem:[%s1168_s6] ss:$0 sm:$0xff]  ;;  %s618_s28 = sshll.u32 %s930_s4, 4  ;;  %s619_s28 = int_to_ptr.vmem [resolvable:$true] %s618_s28 }
  0x24   :  { %529 = vmatpush.bf16.msrb.mxu2 %v888_v39  ;;  %491 = vmatmul.bf16.vlgmr.msra.gmra.mxu3 %v38_v44 }
  0x25   :  { %566 = vmatpush.bf16.msrb.mxu3 %v890_v1 }
  0x26   :  { %497 = vmatpush.bf16.msrb.mxu0 %v878_v41 }
  0x27   :  { %510 = vmatpush.bf16.msrb.mxu1 %v886_v42 }
  0x28   :  { %596 = vmatpush.bf16.msra.mxu2 %v891_v8 }
  0x29   :  { %567 = vmatpush.bf16.msrb.mxu3 %v889_v4 }
  0x2a   :  { %498 = vmatpush.bf16.msrb.mxu0 %v877_v45 }
  0x2b   :  { %511 = vmatpush.bf16.msrb.mxu1 %v885_v46 }
  0x2e   :  { %499 = vmatpush.bf16.msrb.mxu0 %v876_v47 }
  0x2f   :  { %512 = vmatpush.bf16.msrb.mxu1 %v884_v48 }
  0x32   :  { %500 = vmatpush.bf16.msrb.mxu0 %v875_v49 }
  0x33   :  { %513 = vmatpush.bf16.msrb.mxu1 %v883_v50  ;;  %825 = vmatmul.msk.bf16.vlgmr.msrb.gmra.mxu2 %vm440_vm0, %v41_v54 }
  0x36   :  { %501 = vmatpush.bf16.msrb.mxu0 %v874_v52 }
  0x37   :  { %514 = vmatpush.bf16.msrb.mxu1 %v882_v53 }
  0x3a   :  { %502 = vmatpush.bf16.msrb.mxu0 %v873_v55 }
  0x3b   :  { %515 = vmatpush.bf16.msrb.mxu1 %v881_v56 }
  0x3e   :  { %503 = vmatpush.bf16.msrb.mxu0 %v872_v57 }
  0x3f   :  { %516 = vmatpush.bf16.msrb.mxu1 %v880_v58 }
  0x41   :  { %504 = vmatmul.bf16.vlgmr.msrb.gmra.mxu0 %v39_v61 }
  0x42   :  { %517 = vmatmul.bf16.vlgmr.msrb.gmra.mxu1 %v40_v62 }
  0x9e   :  { %v453_v63 = vpop.f32.mrf.mxu0 }
  0x9f   :  { %v466_v0 = vpop.f32.mrf.mxu1  ;;  %v454_v9 = vadd.f32 %v893_v7, %v453_v63 }
  0xa1   :  { %v467_v12 = vadd.f32 %v466_v0, %v454_v9 }
  0xa6   :  { %v455_v2 = vpop.f32.mrf.mxu0  ;;  %v479_v5 = vpop.f32.mrf.mxu2 }
  0xa7   :  { %v468_v3 = vpop.f32.mrf.mxu1  ;;  %v492_v6 = vpop.f32.mrf.mxu3  ;;  %v480_v13 = vadd.f32 %v479_v5, %v467_v12 }
  0xa9   :  { %v493_v15 = vadd.f32 %v492_v6, %v480_v13 }
  0xae   :  { %v481_v10 = vpop.f32.mrf.mxu2 }
  0xaf   :  { %v494_v11 = vpop.f32.mrf.mxu3 }
  0xb6   :  { %v531_v14 = vpop.f32.mrf.mxu2 }
  0xbe   :  { %v505_v16 = vpop.f32.mrf.mxu0  ;;  %v533_v20 = vpop.f32.mrf.mxu2 }
  0xbf   :  { %v518_v17 = vpop.f32.mrf.mxu1  ;;  %v506_v18 = vadd.f32 %v505_v16, %v493_v15 }
  0xc1   :  { %v519_v19 = vadd.f32 %v518_v17, %v506_v18 }
  0xc3   :  { %v532_v21 = vadd.f32 %v531_v14, %v519_v19 }
  0xc5   :  { %896 = vtanh.f32 %v532_v21 }
  0xc6   :  { %v507_v22 = vpop.f32.mrf.mxu0 }
  0xc7   :  { %v520_v23 = vpop.f32.mrf.mxu1 }
  0xcb   :  { %v897_v24 = vpop.eup %896 }
  0xcc   :  { %v536_v25 = vpack.c.bf16 %v897_v24, %v897_v24 }
  0xce   :  { %834 = vmatmul.msk.bf16.vlgmr.msrb.gmra.mxu3 %vm556_vm1, %v536_v25 }
 0x151   :  { %v569_v27 = vpop.f32.mrf.mxu3 }
 0x152   :  { %v570_v28 = vadd.f32 %v894_v26, %v569_v27 }
 0x154   :  { %898 = vtanh.f32 %v570_v28 }
 0x159   :  { %v571_v29 = vpop.f32.mrf.mxu3 }
 0x15a   :  { %v899_v30 = vpop.eup %898 }
 0x15b   :  { %v574_v31 = vpack.c.bf16 %v899_v30, %v899_v30 }
 0x15d   :  { %839 = vmatmul.msk.bf16.vlgmr.msra.gmra.mxu2 %vm440_vm0, %v574_v31 }
 0x1e0   :  { %v598_v33 = vpop.f32.mrf.mxu2 }
 0x1e1   :  { %v599_v34 = vadd.f32 %v895_v32, %v598_v33 }
 0x1e3   :  { %602 = vmax.xlane.f32.xlu0 %v599_v34 }
 0x1e8   :  { %v600_v35 = vpop.f32.mrf.mxu2 }
 0x256   :  { %v603_v36 = vpop.xlane.xlu0 %602 }
 0x257   :  { %v604_v37 = vsub.f32 %v599_v34, %v603_v36 }
 0x259   :  { %v605_v38 = vmul.f32 1.442695, %v604_v37 }
 0x25b   :  { %900 = vpow2.f32 %v605_v38 }
 0x261   :  { %v901_v39 = vpop.eup %900 }
 0x262   :  { %607 = vadd.xlane.f32.xlu0 %v901_v39 }
 0x2d5   :  { %v608_v40 = vpop.xlane.xlu0 %607 }
 0x2d6   :  { %902 = vlog2.f32 %v608_v40 }
 0x2dc   :  { %v903_v41 = vpop.eup %902 }
 0x2dd   :  { %v610_v42 = vmul.f32 0.6931472, %v903_v41 }
 0x2df   :  { %v611_v43 = vsub.f32 %v604_v37, %v610_v42 }
 0x2e1   :  { %612 = vst [vmem:[#allocation2] sm:$0xff] %v611_v43 }
 0x2e2   :  { %623 = dma.vmem_to_hbm [thread:$0]  %s619_s28, 128, %s621_s8, [#allocation3]  }
 0x2e3   :  { %928 = dma.done.wait [#allocation3], 128  }
 0x2e4   :  { %929 = vsyncadd [#allocation3], 4294967168 }
 0x2e5   :  { %628 = vsyncpa [#allocation3], 1 }

</bundles_post_ra>
